<compile_context>
chip_gen: v5e
topology: v5e:2x2
jax: 0.10.0
libtpu: 0.0.40
codegen_flags: <defaults>
</compile_context>

<pallas_src>
import jax
import jax.numpy as jnp
from jax.experimental import pallas as pl
from jax.experimental.pallas import tpu as pltpu

LANES = 128


def _locked_dropout_kernel(mask_ref, x_ref, o_ref):
    # mask_ref: (1, tile_c), pre-scaled keep-mask in x.dtype (locked over seq)
    # x_ref / o_ref: (tile_s, tile_c)
    o_ref[...] = x_ref[...] * mask_ref[...]


def _sublane_granule(dtype):
    # Rows per packed vreg group: 8 for 4-byte, 16 for bf16/fp16, 32 for 1-byte.
    return max(8, 32 // jnp.dtype(dtype).itemsize)


def _choose_tiles(S, C, dtype, block_budget_bytes):
    """Pick (tile_s, tile_c) with one x-block <= block_budget_bytes and a block
    shape satisfying the TPU (8, 128) tiling rules (or full array extents).
    C is assumed to be a multiple of 128 (padded by the wrapper)."""
    itemsize = jnp.dtype(dtype).itemsize
    gran = _sublane_granule(dtype)
    row_bytes = C * itemsize

    if gran * row_bytes <= block_budget_bytes:
        # Full-row branch (lane-dense, tile_c == C).  Here rows >= gran, so the
        # block never exceeds the budget (old rows<8 edge case falls through
        # to the column-tiled branch below instead).
        tile_c = C
        rows = block_budget_bytes // max(row_bytes, 1)
        tile_s = S if rows >= S else min(S, max(gran, (rows // gran) * gran))
        return tile_s, tile_c

    # Wide-row branch: tile the (128-multiple) column axis too.
    tile_s = S if S <= gran else gran
    cols = block_budget_bytes // max(tile_s * itemsize, 1)
    tile_c = min(C, max(LANES, (cols // LANES) * LANES))
    return tile_s, tile_c


def locked_dropout(x, key, *, p=0.5, training=True,
                   block_budget_bytes=8 * 1024 * 1024):
    """LockedDropout forward: x * mask / (1 - p) with a per-(batch, hidden)
    Bernoulli(1-p) mask shared across all time steps.

    x: [seq_len, batch, hidden].  `p` must be a Python scalar with 0 <= p < 1
    (matching the PyTorch module; p == 1 would produce NaNs there too).
    """
    if not training or not p:
        return x
    if not (0.0 <= p < 1.0):
        raise ValueError("locked_dropout requires 0 <= p < 1")

    S, B, H = x.shape
    C = B * H
    itemsize = jnp.dtype(x.dtype).itemsize

    # Locked mask: built in f32 (correctly-rounded scale), cast once to x.dtype.
    keep = jax.random.bernoulli(key, 1.0 - p, (1, B, H)).astype(jnp.float32)
    mask = (keep * (1.0 / (1.0 - p))).astype(x.dtype).reshape(1, C)

    x2 = x.reshape(S, C)

    # Lane-dense minor dim: pad B*H up to a multiple of 128 so output stores are
    # unmasked full-width vst.  No-op for typical hidden sizes.
    C_pad = ((C + LANES - 1) // LANES) * LANES
    if C_pad != C:
        x2 = jnp.pad(x2, ((0, 0), (0, C_pad - C)))
        mask = jnp.pad(mask, ((0, 0), (0, C_pad - C)))

    # Per-chip VMEM cap with ~25% headroom (v7x: 48 MiB; v5e/v6e: 96 MiB).
    try:
        phys_vmem = pltpu.get_tpu_info().vmem_capacity_bytes
    except Exception:  # pragma: no cover - defensive fallback
        phys_vmem = 64 << 20
    vmem_cap = phys_vmem - phys_vmem // 4

    # Keep 2x double-buffered x + 2x out blocks + margin under the cap.
    eff_budget = min(block_budget_bytes,
                     max(1 << 20, (vmem_cap - (4 << 20)) // 4))

    tile_s, tile_c = _choose_tiles(S, C_pad, x.dtype, eff_budget)

    blk_bytes = tile_s * tile_c * itemsize
    mask_bytes = tile_c * itemsize
    vmem_limit = int(min(vmem_cap,
                         max(16 << 20,
                             4 * blk_bytes + 2 * mask_bytes + (4 << 20))))

    grid_s = pl.cdiv(S, tile_s)
    grid_c = pl.cdiv(C_pad, tile_c)

    if grid_c == 1:
        # Common case: one lane-dense block spans the whole (padded) row.
        grid = (grid_s,)
        in_specs = [
            pl.BlockSpec((1, tile_c), lambda i: (0, 0)),        # locked mask
            pl.BlockSpec((tile_s, tile_c), lambda i: (i, 0)),   # x
        ]
        out_specs = pl.BlockSpec((tile_s, tile_c), lambda i: (i, 0))
        dims = ("parallel",)
    else:
        # Wide-C regime: column axis j OUTER (slow) so the mask block index
        # (0, j) is unchanged across the inner row sweep (no per-step re-DMA).
        grid = (grid_c, grid_s)
        in_specs = [
            pl.BlockSpec((1, tile_c), lambda j, i: (0, j)),      # locked mask
            pl.BlockSpec((tile_s, tile_c), lambda j, i: (i, j)),  # x
        ]
        out_specs = pl.BlockSpec((tile_s, tile_c), lambda j, i: (i, j))
        dims = ("parallel", "parallel")

    out = pl.pallas_call(
        _locked_dropout_kernel,
        out_shape=jax.ShapeDtypeStruct((S, C_pad), x.dtype),
        grid=grid,
        in_specs=in_specs,
        out_specs=out_specs,
        compiler_params=pltpu.CompilerParams(
            dimension_semantics=dims,
            vmem_limit_bytes=vmem_limit,
        ),
    )(mask, x2)

    if C_pad != C:
        out = out[:, :C]
    return out.reshape(S, B, H)


if __name__ == "__main__":
    # Shapes consistent with the module's [seq, batch, hidden] input.
    S, B, H = 8, 4, 32
    p = 0.5

    root = jax.random.PRNGKey(0)
    x_key, mask_key = jax.random.split(root)
    x = jax.random.normal(x_key, (S, B, H), dtype=jnp.float32)

    out = jax.block_until_ready(locked_dropout(x, mask_key, p=p, training=True))

    # --- sanity checks of LockedDropout semantics ---
    assert out.shape == x.shape and out.dtype == x.dtype

    # Exact reference: same key -> same mask.
    keep_ref = jax.random.bernoulli(mask_key, 1.0 - p, (1, B, H)).astype(jnp.float32)
    ref = x * keep_ref * (1.0 / (1.0 - p))
    assert jnp.allclose(out, ref, atol=1e-6), "kernel output != reference"

    # Mask is identical ("locked") across every time step.
    ratio0 = out[0] / jnp.where(x[0] == 0, 1.0, x[0])
    for t in range(1, S):
        ratio_t = out[t] / jnp.where(x[t] == 0, 1.0, x[t])
        assert jnp.allclose(ratio_t, ratio0, atol=1e-5), "mask not locked across time"

    # Mask values are {0, 1/(1-p)}.
    ok = jnp.isclose(ratio0, 0.0, atol=1e-5) | jnp.isclose(ratio0, 1.0 / (1.0 - p), atol=1e-4)
    assert bool(jnp.all(ok)), "mask values are not {0, 1/(1-p)}"

    # Eval mode / p=0 passthrough.
    assert jnp.array_equal(locked_dropout(x, mask_key, p=p, training=False), x)
    assert jnp.array_equal(locked_dropout(x, mask_key, p=0.0, training=True), x)

    # Non-128-multiple minor dim (exercises the lane-padding path).
    xb = jax.random.normal(x_key, (6, 3, 24), dtype=jnp.float32)
    ob = jax.block_until_ready(locked_dropout(xb, mask_key, p=0.25))
    kb = jax.random.bernoulli(mask_key, 0.75, (1, 3, 24)).astype(jnp.float32)
    assert jnp.allclose(ob, xb * kb / 0.75, atol=1e-6), "padded-C path mismatch"

    # Wide-C column-tiled path (column axis as the outer grid axis).
    xw = jax.random.normal(x_key, (16, 4, 512), dtype=jnp.float32)
    ow = jax.block_until_ready(
        locked_dropout(xw, mask_key, p=0.5, block_budget_bytes=32 * 1024))
    kw = jax.random.bernoulli(mask_key, 0.5, (1, 4, 512)).astype(jnp.float32)
    assert jnp.allclose(ow, xw * kw * 2.0, atol=1e-6), "column-tiled path mismatch"

    print("KERNEL_OK")
</pallas_src>

<mosaic_0001>
module attributes {stable_mosaic.version = 11 : i64} {
  func.func @_locked_dropout_kernel(%arg0: i32, %arg1: memref<1x128xf32, #tpu.memory_space<vmem>>, %arg2: memref<8x128xf32, #tpu.memory_space<vmem>>, %arg3: memref<8x128xf32, #tpu.memory_space<vmem>>) attributes {dimension_semantics = [#tpu.dimension_semantics<parallel>], iteration_bounds = array<i64: 1>, scalar_prefetch = 0 : i64, scratch_operands = 0 : i64, tpu.core_type = #tpu.core_type<tc>, window_params = [{pipeline_mode = #tpu.pipeline_mode<synchronous>, transform_indices = @transform_0, window_bounds = array<i64: 1, 128>}, {transform_indices = @transform_1, window_bounds = array<i64: 8, 128>}, {transform_indices = @transform_2, window_bounds = array<i64: 8, 128>}]} {
    %c0 = arith.constant 0 : index
    %c0_0 = arith.constant 0 : index
    %0 = vector.load %arg2[%c0, %c0_0] : memref<8x128xf32, #tpu.memory_space<vmem>>, vector<8x128xf32>
    %c0_1 = arith.constant 0 : index
    %c0_2 = arith.constant 0 : index
    %1 = vector.load %arg1[%c0_1, %c0_2] : memref<1x128xf32, #tpu.memory_space<vmem>>, vector<1x128xf32>
    %2 = vector.broadcast %1 : vector<1x128xf32> to vector<8x128xf32>
    %3 = arith.mulf %0, %2 : vector<8x128xf32>
    %c0_3 = arith.constant 0 : index
    %c0_4 = arith.constant 0 : index
    %4 = vector.load %arg3[%c0_3, %c0_4] : memref<8x128xf32, #tpu.memory_space<vmem>>, vector<8x128xf32>
    tpu.vector_store %arg3[%c0_3, %c0_4], %3 {strides = array<i32>} : memref<8x128xf32, #tpu.memory_space<vmem>>, vector<8x128xf32>,
    return
  }
  func.func @transform_0(%arg0: i32) -> (i32, i32) {
    %c0_i32 = arith.constant 0 : i32
    %c0_i32_0 = arith.constant 0 : i32
    %c0_i32_1 = arith.constant 0 : i32
    return %c0_i32, %c0_i32_0 : i32, i32
  }
  func.func @transform_1(%arg0: i32) -> (i32, i32) {
    %c0_i32 = arith.constant 0 : i32
    %c0_i32_0 = arith.constant 0 : i32
    return %arg0, %c0_i32 : i32, i32
  }
  func.func @transform_2(%arg0: i32) -> (i32, i32) {
    %c0_i32 = arith.constant 0 : i32
    %c0_i32_0 = arith.constant 0 : i32
    return %arg0, %c0_i32 : i32, i32
  }
}

</mosaic_0001>

<bundles_post_ra>
// kernel: tpu_custom_call.1
= control target key start
LH: loop header
LB: loop body
LE: loop exit
PB: predicated region body
PF: predicated region fallthrough
CT: control target
= control target key end

     0   :  { %7 = vsyncpa [#allocation3], 0  ;;  %s174_s0 = inlined_call_operand.hbm [shape: f32[1,128], index: 0, kind: input, shape index: {}]   ;;  %s175_s1 = inlined_call_operand.hbm [shape: f32[8,128], index: 1, kind: input, shape index: {}]   ;;  %s176_s2 = inlined_call_operand.hbm [shape: f32[8,128], index: 2, kind: output, shape index: {}]  }
   0x1   :  { %8 = vsyncpa [#allocation6], 0 }
   0x2   :  { %9 = vsyncpa [#allocation4], 0  ;;  %s15_s11 = sshll.u32 %s174_s0, 4  ;;  %s147_s12 = smov [#allocation2]   ;;  %s16_s11 = int_to_ptr.hbm [resolvable:$true] %s15_s11 }
   0x3   :  { %s17_s13 = sshll.u32 %s147_s12, 4  ;;  %s26_s16 = sshll.u32 %s175_s1, 4  ;;  %s18_s13 = int_to_ptr.vmem [resolvable:$true] %s17_s13  ;;  %s27_s16 = int_to_ptr.hbm [resolvable:$true] %s26_s16 }
   0x4   :  { %20 = dma.hbm_to_vmem [thread:$0]  %s16_s11, 16, %s18_s13, [#allocation3]  }
   0x5   :  { %s148_s17 = smov [#allocation5]  }
   0x6   :  { %s28_s18 = sshll.u32 %s148_s17, 4  ;;  %s29_s18 = int_to_ptr.vmem [resolvable:$true] %s28_s18 }
   0x7   :  { %31 = dma.hbm_to_vmem [thread:$0]  %s27_s16, 128, %s29_s18, [#allocation6]  }
   0x8   :  { %141 = dma.done.wait [#allocation3], 16  }
   0x9   :  { %142 = vsyncadd [#allocation3], 4294967280 }
   0xa   :  { %143 = dma.done.wait [#allocation6], 128  }
   0xb   :  { %144 = vsyncadd [#allocation6], 4294967168  ;;  %s149_s19 = smov [#allocation7]   ;;  %s54_s22 = sshll.u32 %s176_s2, 4  ;;  %v40_v0 = vld [vmem:[#allocation5] sm:$0xff]  ;;  %s55_s22 = int_to_ptr.hbm [resolvable:$true] %s54_s22 }
   0xc   :  { %s52_s0 = sshll.u32 %s149_s19, 4  ;;  %v68_v1 = vld [vmem:[#allocation2] ss:$0 sm:$0xff]  ;;  %s53_s0 = int_to_ptr.vmem [resolvable:$true] %s52_s0 }
   0xd   :  { %v45_v2 = vmul.f32 %v68_v1, %v40_v0 }
   0xf   :  { %46 = vst [vmem:[#allocation7] sm:$0xff] %v45_v2 }
  0x10   :  { %57 = dma.vmem_to_hbm [thread:$0]  %s53_s0, 128, %s55_s22, [#allocation4]  }
  0x11   :  { %145 = dma.done.wait [#allocation4], 128  }
  0x12   :  { %146 = vsyncadd [#allocation4], 4294967168 }
  0x13   :  { %62 = vsyncpa [#allocation3], 1 }
  0x14   :  { %63 = vsyncpa [#allocation6], 1 }
  0x15   :  { %64 = vsyncpa [#allocation4], 1 }

</bundles_post_ra>
